<compile_context>
chip_gen: v7x
topology: tpu7x:2x2x1
jax: 0.10.0
libtpu: 0.0.40
codegen_flags: <defaults>
</compile_context>

<pallas_src>
import functools

import jax
import jax.numpy as jnp
from jax.experimental import pallas as pl
from jax.experimental.pallas import tpu as pltpu


def _bce_ls_kernel(x_ref, t_ref, out_ref, *, label_smoothing, pos_weight,
                   block_rows, tiles_per_part, num_rows, apply_mask):
    p = pl.program_id(0)  # parallel split (TensorCore) index
    t = pl.program_id(1)  # reduction tile index within the split

    @pl.when(t == 0)
    def _():
        out_ref[...] = jnp.zeros_like(out_ref)

    x = x_ref[...].astype(jnp.float32)
    tgt = t_ref[...].astype(jnp.float32)

    # label smoothing: target = target * (1 - ls) + 0.5 * ls
    if label_smoothing:
        tgt = tgt * (1.0 - label_smoothing) + 0.5 * label_smoothing

    # Numerically stable BCE-with-logits; log1p/exp computed exactly once.
    lse = jnp.log1p(jnp.exp(-jnp.abs(x)))          # log(1 + exp(-|x|))
    if pos_weight is None:
        # loss = max(x, 0) - x*t + log(1 + exp(-|x|))
        loss = jnp.maximum(x, 0.0) - x * tgt + lse
    else:
        # softplus(-x) = log(1 + exp(-|x|)) + max(-x, 0)
        sp_neg_x = lse + jnp.maximum(-x, 0.0)
        pw = jnp.float32(pos_weight)
        loss = pw * tgt * sp_neg_x + (1.0 - tgt) * (x + sp_neg_x)

    if apply_mask:
        row_start = (p * tiles_per_part + t) * block_rows
        rows = row_start + jax.lax.broadcasted_iota(jnp.int32, loss.shape, 0)
        loss = jnp.where(rows < num_rows, loss, 0.0)

    # Fold (block_rows, cols) -> (8, cols): layout-preserving reshape of the
    # sublane axis + VPU adds across sublane-tile groups. The cross-lane XLU
    # reduce is deferred to the wrapper (runs once, off the carried chain).
    br, n = loss.shape
    if br > 8:
        partial = loss.reshape(br // 8, 8, n).sum(axis=0)
    else:
        partial = loss
    out_ref[...] += partial


def _round_up(x, m):
    return -(-x // m) * m


def _choose_block_rows(num_rows, num_cols, in_itemsize):
    # Keep each pipelined input buffer around <=2 MiB and f32 intermediates
    # around ~1 MiB per value, so 2 inputs x 2 buffers + temps stay well under
    # every generation's scoped-VMEM budget (incl. v7x's 64 MiB physical VMEM).
    rows_by_input = (2 << 20) // max(1, num_cols * in_itemsize)
    rows_by_f32 = (1 << 20) // max(1, num_cols * 4)
    rows = min(rows_by_input, rows_by_f32, _round_up(num_rows, 8))
    rows = max(8, (rows // 8) * 8)
    return rows


def binary_label_smooth_loss(logits, target, *, label_smoothing=0.1,
                             pos_weight=None, block_rows=None):
    """Pallas equivalent of BinaryLabelSmoothLoss.forward (reduction='mean')."""
    assert logits.shape == target.shape
    assert logits.ndim == 2, "expects 2-D (batch, classes) inputs"
    num_rows, num_cols = logits.shape
    total_count = num_rows * num_cols

    in_itemsize = max(jnp.dtype(logits.dtype).itemsize,
                      jnp.dtype(target.dtype).itemsize)
    if block_rows is None:
        block_rows = _choose_block_rows(num_rows, num_cols, in_itemsize)
    block_rows = max(8, (int(block_rows) // 8) * 8)

    num_tiles = -(-num_rows // block_rows)
    # Split the row range across 2 TensorCores (wins on v7x; no-op on 1-TC chips).
    num_parts = 2 if num_tiles >= 2 else 1
    tiles_per_part = -(-num_tiles // num_parts)
    apply_mask = (num_parts * tiles_per_part * block_rows) != num_rows
    last_block = num_tiles - 1

    if num_parts * tiles_per_part == num_tiles:
        def in_map(p, t):
            return (p * tiles_per_part + t, 0)
    else:
        # Clamp phantom tiles (p*T + t >= num_tiles) onto the last real block;
        # the row mask zeroes their contribution.
        def in_map(p, t):
            return (jnp.minimum(p * tiles_per_part + t, last_block), 0)

    kernel = functools.partial(
        _bce_ls_kernel,
        label_smoothing=label_smoothing,
        pos_weight=pos_weight,
        block_rows=block_rows,
        tiles_per_part=tiles_per_part,
        num_rows=num_rows,
        apply_mask=apply_mask,
    )

    # VMEM budget: 2 inputs x 2 pipeline buffers + f32 temps + output accumulator.
    tile_in_bytes = block_rows * num_cols * in_itemsize
    f32_tile_bytes = block_rows * num_cols * 4
    vmem_estimate = 4 * tile_in_bytes + 4 * f32_tile_bytes + 8 * num_cols * 4
    vmem_limit_bytes = int(min(60 << 20, max(24 << 20, vmem_estimate + (2 << 20))))

    partial = pl.pallas_call(
        kernel,
        out_shape=jax.ShapeDtypeStruct((num_parts * 8, num_cols), jnp.float32),
        grid_spec=pltpu.PrefetchScalarGridSpec(
            num_scalar_prefetch=0,
            grid=(num_parts, tiles_per_part),
            in_specs=[
                pl.BlockSpec((block_rows, num_cols), in_map),
                pl.BlockSpec((block_rows, num_cols), in_map),
            ],
            out_specs=pl.BlockSpec((8, num_cols), lambda p, t: (p, 0)),
        ),
        compiler_params=pltpu.CompilerParams(
            dimension_semantics=("parallel", "arbitrary"),
            vmem_limit_bytes=vmem_limit_bytes,
        ),
    )(logits, target)

    # Final cross-lane reduction + 'mean' divide on a tiny array.
    return jnp.sum(partial) / jnp.float32(total_count)


def _reference(logits, target, label_smoothing=0.1, pos_weight=None):
    x = logits.astype(jnp.float32)
    t = target.astype(jnp.float32)
    if label_smoothing:
        t = t * (1.0 - label_smoothing) + 0.5 * label_smoothing
    lse = jnp.log1p(jnp.exp(-jnp.abs(x)))
    if pos_weight is None:
        loss = jnp.maximum(x, 0.0) - x * t + lse
    else:
        sp_neg_x = lse + jnp.maximum(-x, 0.0)
        loss = pos_weight * t * sp_neg_x + (1.0 - t) * (x + sp_neg_x)
    return jnp.mean(loss)


if __name__ == "__main__":
    key = jax.random.PRNGKey(0)
    k1, k2, k3, k4 = jax.random.split(key, 4)

    # Case 1: small demo shape (16 tokens x 128 binary logits), f32.
    # Auto tile sizing collapses this to a single grid step (no pipelining).
    B, S = 16, 128
    logits = jax.random.normal(k1, (B, S), dtype=jnp.float32) * 2.0
    target = (jax.random.uniform(k2, (B, S)) > 0.5).astype(jnp.float32)
    loss = jax.block_until_ready(
        binary_label_smooth_loss(logits, target, label_smoothing=0.1))
    ref = _reference(logits, target, label_smoothing=0.1)
    assert jnp.allclose(loss, ref, rtol=1e-5, atol=1e-6), (loss, ref)

    # Case 2: non-divisible rows, bf16 inputs, pos_weight, forced small tiles
    # to exercise the multi-tile / 2-way-parallel / masked-tail / phantom-tile
    # paths on the same code.
    M2, N2 = 300, 256
    logits2 = (jax.random.normal(k3, (M2, N2), dtype=jnp.float32) * 3.0
               ).astype(jnp.bfloat16)
    target2 = (jax.random.uniform(k4, (M2, N2)) > 0.3).astype(jnp.bfloat16)
    loss2 = jax.block_until_ready(
        binary_label_smooth_loss(logits2, target2, label_smoothing=0.1,
                                 pos_weight=2.0, block_rows=128))
    ref2 = _reference(logits2, target2, label_smoothing=0.1, pos_weight=2.0)
    assert jnp.allclose(loss2, ref2, rtol=1e-4, atol=1e-5), (loss2, ref2)

    print("KERNEL_OK")
</pallas_src>

<mosaic_0001>
module attributes {stable_mosaic.version = 11 : i64} {
  func.func @_bce_ls_kernel(%arg0: i32, %arg1: i32, %arg2: memref<16x128xf32, #tpu.memory_space<vmem>>, %arg3: memref<16x128xf32, #tpu.memory_space<vmem>>, %arg4: memref<8x128xf32, #tpu.memory_space<vmem>>) attributes {dimension_semantics = [#tpu.dimension_semantics<parallel>, #tpu.dimension_semantics<arbitrary>], iteration_bounds = array<i64: 1, 1>, scalar_prefetch = 0 : i64, scratch_operands = 0 : i64, tpu.core_type = #tpu.core_type<tc>, window_params = [{transform_indices = @transform_0, window_bounds = array<i64: 16, 128>}, {transform_indices = @transform_1, window_bounds = array<i64: 16, 128>}, {transform_indices = @transform_2, window_bounds = array<i64: 8, 128>}]} {
    %c0_i32 = arith.constant 0 : i32
    %0 = arith.cmpi eq, %arg1, %c0_i32 : i32
    %1 = arith.extui %0 : i1 to i32
    %c0_i32_0 = arith.constant 0 : i32
    %2 = arith.cmpi ne, %1, %c0_i32_0 : i32
    scf.if %2 {
      %cst_12 = arith.constant 0.000000e+00 : f32
      %24 = vector.broadcast %cst_12 : f32 to vector<8x128xf32>
      %c0_13 = arith.constant 0 : index
      %c0_14 = arith.constant 0 : index
      %25 = vector.load %arg4[%c0_13, %c0_14] : memref<8x128xf32, #tpu.memory_space<vmem>>, vector<8x128xf32>
      tpu.vector_store %arg4[%c0_13, %c0_14], %24 {strides = array<i32>} : memref<8x128xf32, #tpu.memory_space<vmem>>, vector<8x128xf32>,
    } else {
    }
    %c0 = arith.constant 0 : index
    %c0_1 = arith.constant 0 : index
    %3 = vector.load %arg2[%c0, %c0_1] : memref<16x128xf32, #tpu.memory_space<vmem>>, vector<16x128xf32>
    %c0_2 = arith.constant 0 : index
    %c0_3 = arith.constant 0 : index
    %4 = vector.load %arg3[%c0_2, %c0_3] : memref<16x128xf32, #tpu.memory_space<vmem>>, vector<16x128xf32>
    %cst = arith.constant 0.899999976 : f32
    %5 = vector.broadcast %cst : f32 to vector<16x128xf32>
    %6 = arith.mulf %4, %5 : vector<16x128xf32>
    %cst_4 = arith.constant 5.000000e-02 : f32
    %7 = vector.broadcast %cst_4 : f32 to vector<16x128xf32>
    %8 = arith.addf %6, %7 : vector<16x128xf32>
    %9 = math.absf %3 : vector<16x128xf32>
    %cst_5 = arith.constant 0.000000e+00 : f32
    %10 = vector.broadcast %cst_5 : f32 to vector<16x128xf32>
    %11 = arith.subf %10, %9 : vector<16x128xf32>
    %12 = math.exp %11 : vector<16x128xf32>
    %13 = math.log1p %12 : vector<16x128xf32>
    %cst_6 = arith.constant 0.000000e+00 : f32
    %14 = vector.broadcast %cst_6 : f32 to vector<16x128xf32>
    %15 = arith.maximumf %3, %14 : vector<16x128xf32>
    %16 = arith.mulf %3, %8 : vector<16x128xf32>
    %17 = arith.subf %15, %16 : vector<16x128xf32>
    %18 = arith.addf %17, %13 : vector<16x128xf32>
    %19 = vector.shape_cast %18 : vector<16x128xf32> to vector<2x8x128xf32>
    %cst_7 = arith.constant dense<0.000000e+00> : vector<8x128xf32>
    %20 = vector.multi_reduction <add>, %19, %cst_7 [0] : vector<2x8x128xf32> to vector<8x128xf32>
    %c0_8 = arith.constant 0 : index
    %c0_9 = arith.constant 0 : index
    %21 = vector.load %arg4[%c0_8, %c0_9] : memref<8x128xf32, #tpu.memory_space<vmem>>, vector<8x128xf32>
    %22 = arith.addf %21, %20 : vector<8x128xf32>
    %c0_10 = arith.constant 0 : index
    %c0_11 = arith.constant 0 : index
    %23 = vector.load %arg4[%c0_10, %c0_11] : memref<8x128xf32, #tpu.memory_space<vmem>>, vector<8x128xf32>
    tpu.vector_store %arg4[%c0_10, %c0_11], %22 {strides = array<i32>} : memref<8x128xf32, #tpu.memory_space<vmem>>, vector<8x128xf32>,
    return
  }
  func.func @transform_0(%arg0: i32, %arg1: i32) -> (i32, i32) {
    %c1_i32 = arith.constant 1 : i32
    %0 = arith.muli %arg0, %c1_i32 : i32
    %1 = arith.addi %0, %arg1 : i32
    %c0_i32 = arith.constant 0 : i32
    %c0_i32_0 = arith.constant 0 : i32
    return %1, %c0_i32 : i32, i32
  }
  func.func @transform_1(%arg0: i32, %arg1: i32) -> (i32, i32) {
    %c1_i32 = arith.constant 1 : i32
    %0 = arith.muli %arg0, %c1_i32 : i32
    %1 = arith.addi %0, %arg1 : i32
    %c0_i32 = arith.constant 0 : i32
    %c0_i32_0 = arith.constant 0 : i32
    return %1, %c0_i32 : i32, i32
  }
  func.func @transform_2(%arg0: i32, %arg1: i32) -> (i32, i32) {
    %c0_i32 = arith.constant 0 : i32
    %c0_i32_0 = arith.constant 0 : i32
    return %arg0, %c0_i32 : i32, i32
  }
}

</mosaic_0001>

<bundles_post_ra>
// kernel: tpu_custom_call.1
= control target key start
LH: loop header
LB: loop body
LE: loop exit
PB: predicated region body
PF: predicated region fallthrough
CT: control target
= control target key end

     0   :  { %7 = vsyncpa [#allocation3], 0  ;;  %s261_s0 = inlined_call_operand.hbm [shape: f32[16,128], index: 0, kind: input, shape index: {}]   ;;  %s262_s1 = inlined_call_operand.hbm [shape: f32[16,128], index: 1, kind: input, shape index: {}]   ;;  %s263_s2 = inlined_call_operand.hbm [shape: f32[8,128], index: 2, kind: output, shape index: {}]  }
   0x1   :  { %8 = vsyncpa [#allocation6], 0 }
   0x2   :  { %9 = vsyncpa [#allocation4], 0  ;;  %s205_s9 = smov [#allocation2]   ;;  %s133_s13 = scalar_lea.hbm %s261_s0, 256 }
   0x3   :  { %s19_s10 = sshll.u32 %s205_s9, 4  ;;  %p134_p0 = scmp.ne.s32.totalorder %s261_s0, %s133_s13  ;;  %s20_s10 = int_to_ptr.vmem [resolvable:$true] %s19_s10 }
   0x4   :  { %p137_p1 = scmp.lt.u32.totalorder %s133_s13, %s261_s0 }
   0x6   :  { %p139_p2 = pnand %p137_p1, %p134_p0 }
   0x8   :  { %142 = shalt.err (!%p139_p2)
}
   0x9   :  { %s143_s18 = scalar_lea.vmem %s20_s10, 256  ;;  %p148_p4 = scmp.lt.s32.totalorder %s20_s10, %s20_s10 }
   0xa   :  { %p144_p3 = scmp.ne.s32.totalorder %s20_s10, %s143_s18  ;;  %p149_p5 = scmp.lt.s32.totalorder %s143_s18, %s143_s18 }
   0xc   :  { %p150_p6 = por %p149_p5, %p148_p4 }
   0xe   :  { %p151_p7 = pnand %p150_p6, %p144_p3 }
  0x10   :  { %154 = shalt.err (!%p151_p7)
}
  0x11   :  { %s206_s19 = smov 128   ;;  %s207_s20 = smov 8  }
  0x12   :  { %25 = dma.hbm_to_vmem [thread:$0]  %s261_s0, 256, %s20_s10, [#allocation3], %s206_s19, %s206_s19, %s207_s20  }
  0x13   :  { %s208_s23 = smov [#allocation5]   ;;  %s155_s27 = scalar_lea.hbm %s262_s1, 256 }
  0x14   :  { %s35_s24 = sshll.u32 %s208_s23, 4  ;;  %p156_p8 = scmp.ne.s32.totalorder %s262_s1, %s155_s27  ;;  %s36_s24 = int_to_ptr.vmem [resolvable:$true] %s35_s24 }
  0x15   :  { %p159_p9 = scmp.lt.u32.totalorder %s155_s27, %s262_s1 }
  0x17   :  { %p161_p10 = pnand %p159_p9, %p156_p8 }
  0x19   :  { %164 = shalt.err (!%p161_p10)
}
  0x1a   :  { %s165_s4 = scalar_lea.vmem %s36_s24, 256  ;;  %p170_p12 = scmp.lt.s32.totalorder %s36_s24, %s36_s24 }
  0x1b   :  { %p166_p11 = scmp.ne.s32.totalorder %s36_s24, %s165_s4  ;;  %p171_p13 = scmp.lt.s32.totalorder %s165_s4, %s165_s4 }
  0x1d   :  { %p172_p0 = por %p171_p13, %p170_p12 }
  0x1f   :  { %p173_p1 = pnand %p172_p0, %p166_p11 }
  0x21   :  { %176 = shalt.err (!%p173_p1)
}
  0x22   :  { %41 = dma.hbm_to_vmem [thread:$0]  %s262_s1, 256, %s36_s24, [#allocation6], %s206_s19, %s206_s19, %s207_s20  }
  0x23   :  { %199 = dma.done.wait [#allocation3], 256  }
  0x24   :  { %200 = vsyncadd [#allocation3], 4294967040 }
  0x25   :  { %201 = dma.done.wait [#allocation6], 256  }
  0x26   :  { %202 = vsyncadd [#allocation6], 4294967040  ;;  %v57_v0 = vld [vmem:[#allocation2] sm:$0xff]  ;;  %v58_v1 = vld [vmem:[#allocation2 + $0x8] sm:$0xff]  ;;  %s209_s1 = smov [#allocation7]  }
  0x27   :  { %v65_v2 = vand.u32 2147483647, %v57_v0  ;;  %v66_v3 = vand.u32 2147483647, %v58_v1  ;;  %v59_v8 = vld [vmem:[#allocation5] sm:$0xff]  ;;  %v60_v9 = vld [vmem:[#allocation5 + $0x8] sm:$0xff] }
  0x28   :  { %v61_v12 = vmul.f32 0.9, %v59_v8  ;;  %v62_v14 = vmul.f32 0.9, %v60_v9  ;;  %v91_v23 = vmax.f32 %v57_v0, 0.0  ;;  %v92_v26 = vmax.f32 %v58_v1, 0.0 }
  0x29   :  { %v67_v4 = vsub.f32 0.0, %v65_v2  ;;  %v68_v5 = vsub.f32 0.0, %v66_v3  ;;  %s109_s6 = sshll.u32 %s209_s1, 4  ;;  %s110_s6 = int_to_ptr.vmem [resolvable:$true] %s109_s6 }
  0x2a   :  { %v63_v17 = vadd.f32 0.05, %v61_v12  ;;  %v64_v19 = vadd.f32 0.05, %v62_v14  ;;  %s177_s7 = scalar_lea.vmem %s110_s6, 128  ;;  %p182_p3 = scmp.lt.s32.totalorder %s110_s6, %s110_s6 }
  0x2b   :  { %v69_v6 = vmul.f32 1.442695, %v67_v4  ;;  %v71_v7 = vmul.f32 1.442695, %v68_v5  ;;  %p178_p2 = scmp.ne.s32.totalorder %s110_s6, %s177_s7  ;;  %p183_p4 = scmp.lt.s32.totalorder %s177_s7, %s177_s7 }
  0x2c   :  { %v93_v24 = vmul.f32 %v63_v17, %v57_v0  ;;  %v94_v27 = vmul.f32 %v64_v19, %v58_v1 }
  0x2d   :  { %125 = vpow2.f32 %v69_v6  ;;  %p184_p5 = por %p183_p4, %p182_p3 }
  0x2e   :  { %127 = vpow2.f32 %v71_v7  ;;  %v95_v31 = vsub.f32 %v91_v23, %v93_v24  ;;  %v96_v34 = vsub.f32 %v92_v26, %v94_v27 }
  0x2f   :  { %p185_p6 = pnand %p184_p5, %p178_p2 }
  0x37   :  { %v126_v10 = vpop.eup %125 }
  0x38   :  { %v128_v11 = vpop.eup %127  ;;  %v73_v13 = vadd.f32 1.0, %v126_v10  ;;  %v76_v16 = vmul.f32 -0.5, %v126_v10  ;;  %v79_v21 = vand.u32 2147483647, %v126_v10 }
  0x39   :  { %v82_v15 = vadd.f32 1.0, %v128_v11  ;;  %v85_v18 = vmul.f32 -0.5, %v128_v11  ;;  %v88_v25 = vand.u32 2147483647, %v128_v11 }
  0x3a   :  { %129 = vlog2.f32 %v73_v13  ;;  %v77_v20 = vadd.f32 1.0, %v76_v16  ;;  %vm80_vm0 = vcmp.lt.f32.partialorder %v79_v21, 0.0004427343 }
  0x3b   :  { %131 = vlog2.f32 %v82_v15  ;;  %v86_v22 = vadd.f32 1.0, %v85_v18  ;;  %vm89_vm1 = vcmp.lt.f32.partialorder %v88_v25, 0.0004427343 }
  0x3c   :  { %v78_v28 = vmul.f32 %v126_v10, %v77_v20 }
  0x3d   :  { %v87_v30 = vmul.f32 %v128_v11, %v86_v22 }
  0x44   :  { %v130_v29 = vpop.eup %129 }
  0x45   :  { %v132_v32 = vpop.eup %131  ;;  %v75_v33 = vmul.f32 0.6931472, %v130_v29 }
  0x46   :  { %v84_v35 = vmul.f32 0.6931472, %v132_v32 }
  0x47   :  { %v81_v36 = vsel %vm80_vm0, %v78_v28, %v75_v33 }
  0x48   :  { %v90_v37 = vsel %vm89_vm1, %v87_v30, %v84_v35  ;;  %v97_v38 = vadd.f32 %v95_v31, %v81_v36 }
  0x49   :  { %v98_v39 = vadd.f32 %v96_v34, %v90_v37 }
  0x4b   :  { %v99_v40 = vadd.f32 %v98_v39, %v97_v38 }
  0x4d   :  { %102 = vst [vmem:[#allocation7] sm:$0xff] %v99_v40 }
  0x4e   :  { %188 = shalt.err (!%p185_p6)
}
  0x4f   :  { %s189_s10 = scalar_lea.hbm %s263_s2, 128 }
  0x50   :  { %p190_p7 = scmp.ne.s32.totalorder %s263_s2, %s189_s10  ;;  %p193_p8 = scmp.lt.u32.totalorder %s189_s10, %s263_s2 }
  0x52   :  { %p195_p9 = pnand %p193_p8, %p190_p7 }
  0x54   :  { %198 = shalt.err (!%p195_p9)
}
  0x55   :  { %112 = dma.vmem_to_hbm [thread:$0]  %s110_s6, 128, %s263_s2, [#allocation4]  }
  0x56   :  { %203 = dma.done.wait [#allocation4], 128  }
  0x57   :  { %204 = vsyncadd [#allocation4], 4294967168 }
  0x58   :  { %116 = vsyncpa [#allocation3], 1 }
  0x59   :  { %117 = vsyncpa [#allocation6], 1 }
  0x5a   :  { %118 = vsyncpa [#allocation4], 1 }

</bundles_post_ra>
